<compile_context>
chip_gen: v6e
topology: v6e:2x2x1
jax: 0.10.0
libtpu: 0.0.40
codegen_flags: <defaults>
</compile_context>

<pallas_src>
import functools

import jax
import jax.numpy as jnp
from jax.experimental import pallas as pl
from jax.experimental.pallas import tpu as pltpu


def _layernorm2d_kernel(x_ref, w_ref, b_ref, o_ref, *, eps: float):
    # x_ref: (1, C, T)   w_ref/b_ref: (C, 1)   o_ref: (1, C, T)
    x = x_ref[...].astype(jnp.float32)
    u = jnp.mean(x, axis=1, keepdims=True)            # (1, 1, T) per-pixel mean over C
    xc = x - u
    var = jnp.mean(xc * xc, axis=1, keepdims=True)    # (1, 1, T) biased variance over C
    inv_std = jax.lax.rsqrt(var + eps)                # (1, 1, T)
    w = w_ref[...].astype(jnp.float32)[None, :, :]    # (1, C, 1)
    b = b_ref[...].astype(jnp.float32)[None, :, :]    # (1, C, 1)
    # Folded affine: 2 per-element multiplies total.
    o_ref[...] = (xc * (w * inv_std) + b).astype(o_ref.dtype)


def _tpu_vmem_capacity_bytes() -> int:
    """Best-effort query of VMEM capacity; conservative fallback (v7x = 64 MiB)."""
    try:
        return int(pltpu.get_tpu_info().vmem_capacity_bytes)
    except Exception:  # pragma: no cover - off-TPU / older API
        return 64 * 1024 * 1024


def _choose_hw_tile(C: int, HW: int, itemsize: int, budget_bytes: int) -> int:
    """Largest lane tile (multiple of 128, <= 2048) whose pipelined footprint fits."""
    # Double-buffered input + output tiles resident at once: 4 * C * tile * bytes.
    # Use >= 4-byte elements in the budget to leave headroom for f32 temporaries.
    per_lane_bytes = 4 * C * max(itemsize, 4)
    max_tile = max(128, (budget_bytes // per_lane_bytes) // 128 * 128)
    hw_ceil = -(-HW // 128) * 128                     # HW rounded up to 128
    return min(2048, max_tile, hw_ceil)


def layernorm2d(x: jax.Array, weight: jax.Array, bias: jax.Array,
                eps: float = 1e-6, hw_tile: int | None = None) -> jax.Array:
    """x: (N, C, H, W); weight, bias: (C,).  Returns (N, C, H, W)."""
    N, C, H, W = x.shape
    HW = H * W

    vmem_cap = _tpu_vmem_capacity_bytes()
    tile_budget = min(vmem_cap // 8, 16 * 1024 * 1024)     # keep tiles modest
    vmem_limit = min(vmem_cap // 2, 64 * 1024 * 1024)      # explicit scoped limit

    if hw_tile is None:
        hw_tile = _choose_hw_tile(C, HW, jnp.dtype(x.dtype).itemsize, tile_budget)

    x_flat = x.reshape(N, C, HW)
    hw_pad = -(-HW // hw_tile) * hw_tile
    if hw_pad != HW:
        x_flat = jnp.pad(x_flat, ((0, 0), (0, 0), (0, hw_pad - HW)))
    n_hw = hw_pad // hw_tile

    w2 = weight.reshape(C, 1)
    b2 = bias.reshape(C, 1)

    kernel = functools.partial(_layernorm2d_kernel, eps=eps)

    out_flat = pl.pallas_call(
        kernel,
        out_shape=jax.ShapeDtypeStruct((N, C, hw_pad), x.dtype),
        grid_spec=pltpu.PrefetchScalarGridSpec(
            num_scalar_prefetch=0,
            grid=(N, n_hw),
            in_specs=[
                pl.BlockSpec((1, C, hw_tile), lambda n, h: (n, 0, h)),
                pl.BlockSpec((C, 1), lambda n, h: (0, 0)),
                pl.BlockSpec((C, 1), lambda n, h: (0, 0)),
            ],
            out_specs=pl.BlockSpec((1, C, hw_tile), lambda n, h: (n, 0, h)),
        ),
        compiler_params=pltpu.CompilerParams(
            dimension_semantics=("parallel", "parallel"),
            vmem_limit_bytes=vmem_limit),
    )(x_flat, w2, b2)

    if hw_pad != HW:
        out_flat = out_flat[:, :, :HW]
    return out_flat.reshape(N, C, H, W)


def _reference(x, weight, bias, eps=1e-6):
    u = jnp.mean(x, axis=1, keepdims=True)
    s = jnp.mean((x - u) ** 2, axis=1, keepdims=True)
    y = (x - u) / jnp.sqrt(s + eps)
    return weight[None, :, None, None] * y + bias[None, :, None, None]


if __name__ == "__main__":
    key = jax.random.PRNGKey(0)

    # Deterministic parameter init matching nn.Module.__init__:
    # weight = ones(C), bias = zeros(C)
    C = 4
    weight = jnp.ones((C,), dtype=jnp.float32)
    bias = jnp.zeros((C,), dtype=jnp.float32)

    # Case 1: HW is a multiple of 128 (no padding path).
    x1 = jax.random.normal(key, (2, C, 16, 16), dtype=jnp.float32)
    out1 = jax.block_until_ready(layernorm2d(x1, weight, bias, eps=1e-6))
    assert jnp.allclose(out1, _reference(x1, weight, bias), atol=1e-5, rtol=1e-5), \
        "mismatch vs reference (aligned HW)"

    # Case 2: HW not a multiple of 128 (exercises the pad + slice path).
    x2 = jax.random.normal(jax.random.PRNGKey(1), (2, C, 10, 10), dtype=jnp.float32)
    out2 = jax.block_until_ready(layernorm2d(x2, weight, bias, eps=1e-6))
    assert jnp.allclose(out2, _reference(x2, weight, bias), atol=1e-5, rtol=1e-5), \
        "mismatch vs reference (ragged HW)"

    print("KERNEL_OK")
</pallas_src>

<mosaic_0001>
module attributes {stable_mosaic.version = 11 : i64} {
  func.func @_layernorm2d_kernel(%arg0: i32, %arg1: i32, %arg2: memref<1x4x256xf32, #tpu.memory_space<vmem>>, %arg3: memref<4x1xf32, #tpu.memory_space<vmem>>, %arg4: memref<4x1xf32, #tpu.memory_space<vmem>>, %arg5: memref<1x4x256xf32, #tpu.memory_space<vmem>>) attributes {dimension_semantics = [#tpu.dimension_semantics<parallel>, #tpu.dimension_semantics<parallel>], iteration_bounds = array<i64: 2, 1>, scalar_prefetch = 0 : i64, scratch_operands = 0 : i64, tpu.core_type = #tpu.core_type<tc>, window_params = [{transform_indices = @transform_0, window_bounds = array<i64: 1, 4, 256>}, {pipeline_mode = #tpu.pipeline_mode<synchronous>, transform_indices = @transform_1, window_bounds = array<i64: 4, 1>}, {pipeline_mode = #tpu.pipeline_mode<synchronous>, transform_indices = @transform_2, window_bounds = array<i64: 4, 1>}, {transform_indices = @transform_3, window_bounds = array<i64: 1, 4, 256>}]} {
    %c0 = arith.constant 0 : index
    %c0_0 = arith.constant 0 : index
    %c0_1 = arith.constant 0 : index
    %0 = vector.load %arg2[%c0, %c0_0, %c0_1] : memref<1x4x256xf32, #tpu.memory_space<vmem>>, vector<1x4x256xf32>
    %cst = arith.constant dense<0.000000e+00> : vector<1x256xf32>
    %1 = vector.multi_reduction <add>, %0, %cst [1] : vector<1x4x256xf32> to vector<1x256xf32>
    %2 = vector.shape_cast %1 : vector<1x256xf32> to vector<1x1x256xf32>
    %cst_2 = arith.constant 4.000000e+00 : f32
    %3 = vector.broadcast %cst_2 : f32 to vector<1x1x256xf32>
    %4 = arith.divf %2, %3 : vector<1x1x256xf32>
    %5 = vector.broadcast %4 : vector<1x1x256xf32> to vector<1x4x256xf32>
    %6 = arith.subf %0, %5 : vector<1x4x256xf32>
    %7 = arith.mulf %6, %6 : vector<1x4x256xf32>
    %cst_3 = arith.constant dense<0.000000e+00> : vector<1x256xf32>
    %8 = vector.multi_reduction <add>, %7, %cst_3 [1] : vector<1x4x256xf32> to vector<1x256xf32>
    %9 = vector.shape_cast %8 : vector<1x256xf32> to vector<1x1x256xf32>
    %cst_4 = arith.constant 4.000000e+00 : f32
    %10 = vector.broadcast %cst_4 : f32 to vector<1x1x256xf32>
    %11 = arith.divf %9, %10 : vector<1x1x256xf32>
    %cst_5 = arith.constant 9.99999997E-7 : f32
    %12 = vector.broadcast %cst_5 : f32 to vector<1x1x256xf32>
    %13 = arith.addf %11, %12 : vector<1x1x256xf32>
    %14 = math.rsqrt %13 : vector<1x1x256xf32>
    %c0_6 = arith.constant 0 : index
    %c0_7 = arith.constant 0 : index
    %15 = vector.load %arg3[%c0_6, %c0_7] : memref<4x1xf32, #tpu.memory_space<vmem>>, vector<4x1xf32>
    %16 = vector.shape_cast %15 : vector<4x1xf32> to vector<1x4x1xf32>
    %c0_8 = arith.constant 0 : index
    %c0_9 = arith.constant 0 : index
    %17 = vector.load %arg4[%c0_8, %c0_9] : memref<4x1xf32, #tpu.memory_space<vmem>>, vector<4x1xf32>
    %18 = vector.shape_cast %17 : vector<4x1xf32> to vector<1x4x1xf32>
    %19 = vector.broadcast %16 : vector<1x4x1xf32> to vector<1x4x256xf32>
    %20 = vector.broadcast %14 : vector<1x1x256xf32> to vector<1x4x256xf32>
    %21 = arith.mulf %19, %20 : vector<1x4x256xf32>
    %22 = arith.mulf %6, %21 : vector<1x4x256xf32>
    %23 = vector.broadcast %18 : vector<1x4x1xf32> to vector<1x4x256xf32>
    %24 = arith.addf %22, %23 : vector<1x4x256xf32>
    %c0_10 = arith.constant 0 : index
    %c0_11 = arith.constant 0 : index
    %c0_12 = arith.constant 0 : index
    %25 = vector.load %arg5[%c0_10, %c0_11, %c0_12] : memref<1x4x256xf32, #tpu.memory_space<vmem>>, vector<1x4x256xf32>
    tpu.vector_store %arg5[%c0_10, %c0_11, %c0_12], %24 {strides = array<i32>} : memref<1x4x256xf32, #tpu.memory_space<vmem>>, vector<1x4x256xf32>,
    return
  }
  func.func @transform_0(%arg0: i32, %arg1: i32) -> (i32, i32, i32) {
    %c0_i32 = arith.constant 0 : i32
    %c0_i32_0 = arith.constant 0 : i32
    return %arg0, %c0_i32, %arg1 : i32, i32, i32
  }
  func.func @transform_1(%arg0: i32, %arg1: i32) -> (i32, i32) {
    %c0_i32 = arith.constant 0 : i32
    %c0_i32_0 = arith.constant 0 : i32
    %c0_i32_1 = arith.constant 0 : i32
    return %c0_i32, %c0_i32_0 : i32, i32
  }
  func.func @transform_2(%arg0: i32, %arg1: i32) -> (i32, i32) {
    %c0_i32 = arith.constant 0 : i32
    %c0_i32_0 = arith.constant 0 : i32
    %c0_i32_1 = arith.constant 0 : i32
    return %c0_i32, %c0_i32_0 : i32, i32
  }
  func.func @transform_3(%arg0: i32, %arg1: i32) -> (i32, i32, i32) {
    %c0_i32 = arith.constant 0 : i32
    %c0_i32_0 = arith.constant 0 : i32
    return %arg0, %c0_i32, %arg1 : i32, i32, i32
  }
}

</mosaic_0001>

<bundles_post_ra>
// kernel: tpu_custom_call.1
= control target key start
LH: loop header
LB: loop body
LE: loop exit
PB: predicated region body
PF: predicated region fallthrough
CT: control target
= control target key end

     0   :  { %8 = vsyncpa [#allocation3], 0  ;;  %s756_s0 = inlined_call_operand.hbm [shape: f32[2,4,256], index: 0, kind: input, shape index: {}]   ;;  %s757_s1 = inlined_call_operand.vmem [shape: f32[4,1], index: 1, kind: input, shape index: {}]   ;;  %s758_s2 = inlined_call_operand.vmem [shape: f32[4,1], index: 2, kind: input, shape index: {}]   ;;  %s759_s3 = inlined_call_operand.hbm [shape: f32[2,4,256], index: 3, kind: output, shape index: {}]  }
   0x1   :  { %10 = vsyncpa [#allocation3 + $0x1], 0 }
   0x2   :  { %11 = vsyncpa [#allocation4], 0 }
   0x3   :  { %13 = vsyncpa [#allocation4 + $0x1], 0  ;;  %s608_s12 = smov 0   ;;  %s610_s13 = smov 0  }
   0x4   :  { %s612_s14 = smov 0   ;;  %s614_s15 = smov 0  }
   0x5   :  { %s616_s16 = smov 0   ;;  %s618_s17 = smov 0  }
   0x6 LB: > { %s387_s18 = sadd.s32 4294967295, %s582_s17   ;;  %s388_s19 = sadd.s32 4294967294, %s582_s17   ;;  %s582_s17 = sphi %s618_s17, %s19_s17   ;;  %s578_s16 = sphi %s616_s16, %s771_s16   ;;  %s574_s15 = sphi %s614_s15, %s770_s15   ;;  %s570_s14 = sphi %s612_s14, %s769_s14   ;;  %s566_s13 = sphi %s610_s13, %s768_s13   ;;  %s562_s12 = sphi %s608_s12, %s767_s12  }
   0x7   : > { %s31_s20 = sadd.s32 1, %s578_s16  ;;  %s40_s21 = sadd.s32 1, %s570_s14 }
   0x8   : > { %p33_p0 = scmp.ge.s32.totalorder %s31_s20, 2  ;;  %p47_p1 = scmp.ne.s32.totalorder %s570_s14, %s566_s13 }
   0x9   : > { %p48_p2 = scmp.eq.s32.totalorder %s582_s17, 0  ;;  %p53_p3 = scmp.ne.s32.totalorder %s566_s13, %s562_s12 }
   0xa   : > { %s773_s20 = smov (%p33_p0, %s31_s20), 0  ;;  %p54_p5 = scmp.eq.s32.totalorder %s387_s18, 0 }
   0xb   : > { %p649_p4 = por %p48_p2, %p47_p1  ;;  %s35_s23 = ssub.s32 %s578_s16, %s773_s20 }
   0xc   : > { %p121_p6 = scmp.eq.s32.totalorder %s387_s18, 1  ;;  %p38_p7 = scmp.eq.s32.totalorder %s35_s23, 0 }
   0xd   : > { %p655_p8 = por %p54_p5, %p53_p3  ;;  %p127_p10 = scmp.eq.s32.totalorder %s388_s19, 1 }
   0xe   : > { %p659_p9 = por %p121_p6, %p47_p1  ;;  %p416_p13 = scmp.lt.s32.totalorder %s582_s17, 2 }
   0xf   : > { %s664_s26 = scalar_select %p38_p7, %s570_s14, %s40_s21  }
  0x10   : > { %p666_p11 = por %p127_p10, %p53_p3  ;;  %s153_s28 = sand.u32 1, %s570_s14  }
  0x11   : > { %s391_s29 = sshll.u32 %s153_s28, 3  ;;  %s402_s30 = sshll.u32 %s578_s16, 7 }
  0x12   : > { %s763_s27 = scalar_select %p666_p11, 1, 0 }
  0x13   : > { %s165_s6 = scalar_lea.hbm %s756_s0, %s402_s30  ;;  %s157_s7 = scalar_lea.vmem [#allocation2], %s391_s29 }
  0x14   : > { %s167_s8 = sshll.u32 %s157_s7, 4  ;;  %p679_p0 = pnand %p416_p13, %p649_p4  ;;  %s168_s8 = int_to_ptr.vmem [resolvable:$true] %s167_s8 }
  0x15   : > { %p394_p1 = scmp.ge.s32.totalorder %s582_s17, 1  ;;  %p172_p2 = scmp.lt.s32.totalorder %s582_s17, 3 }
  0x16   : > { %s154_s10 = scalar_lea.sflag [#allocation3], %s153_s28  ;;  %p476_p3 = pneg %p679_p0 }
  0x17   : > { %s487_s11 = scalar_lea.vmem %s168_s8, 128  ;;  %s584_s18 = smov [#allocation2]  }
  0x18   : > { %p488_p5 = scmp.ne.s32.totalorder %s168_s8, %s487_s11  ;;  %s492_s19 = sshll.u32 %s584_s18, 4  ;;  %s493_s19 = int_to_ptr.vmem [resolvable:$false] %s492_s19 }
  0x19   : > { %s494_s21 = scalar_lea.vmem %s493_s19, 256  ;;  %p495_p10 = scmp.lt.s32.totalorder %s168_s8, %s493_s19 }
  0x1a   : > { %p490_p6 = pnand %p488_p5, %p476_p3  ;;  %p496_p12 = scmp.lt.s32.totalorder %s494_s21, %s487_s11 }
  0x1c   : > { %p491_p7 = pneg %p490_p6  ;;  %p497_p4 = por %p496_p12, %p495_p10 }
  0x1e   : > { %p498_p13 = pnand %p497_p4, %p491_p7 }
  0x20   : > { %501 = shalt.err (!%p498_p13)
}
  0x21   : > { %411 = dma.hbm_to_vmem [thread:$0]  (!%p679_p0), %s165_s6, 128, %s168_s8, %s154_s10  }
  0x22   : > { %p173_p11 = pnand %p394_p1, %p172_p2 }
  0x23   : > { %s694_s22 = sand.u32 (!%p173_p11), 1, %s566_s13  }
  0x24   : > { %176 = sbr.rel (%p173_p11) target bundleno = 189 (0xbd), region = 32  ;;  %s395_s23 = sshll.u32 (!%p173_p11), %s694_s22, 3 }
  0x25   : > { %s179_s28 = scalar_lea.sflag (!%p173_p11), [#allocation3], %s694_s22  ;;  %s182_s29 = scalar_lea.vmem (!%p173_p11), [#allocation2], %s395_s23 }
  0x29   : > { %553 = dma.done.wait (%p655_p8), %s179_s28, 128  }
  0x2a   : > { %555 = vsyncadd (%p655_p8), %s179_s28, 4294967168  ;;  %v585_v0 = vmov 0   ;;  %v258_v1 = vld [vmem:[%s757_s1] sm:$0xf]  ;;  %vm211_vm0 = vcmask 1043456   ;;  %v279_v45 = vlaneseq  ;;  %s403_s24 = sshll.u32 %s574_s15, 7 }
  0x2b   : > { %468 = vset.pattern.permute.xlu0 %v585_v0  ;;  %v259_v2 = vld [vmem:[%s758_s2] sm:$0xf]  ;;  %v586_v43 = vmov 839922192   ;;  %s204_s7 = scalar_lea.vmem [#allocation5], %s395_s23  ;;  %s301_s11 = scalar_lea.hbm %s759_s3, %s403_s24 }
  0x2c   : > { %262 = vperm.xlu0 %468, %v258_v1   ;;  %v207_v3 = vld [vmem:[%s182_s29] sm:$0xff]  ;;  %v277_v44 = vunpack.c.l.s4 %v586_v43  ;;  %v280_v48 = vshrl.u32 %v279_v45, 7  ;;  %s303_s8 = sshll.u32 %s204_s7, 4  ;;  %s287_s18 = scalar_lea.sflag [#allocation4], %s694_s22  ;;  %s304_s8 = int_to_ptr.vmem [resolvable:$true] %s303_s8 }
  0x2d   : > { %v209_v4 = vcombine.high %v207_v3, %v207_v3  ;;  %v212_v5 = vsel %vm211_vm0, %v207_v3, 0.0  ;;  %s502_s19 = scalar_lea.vmem %s304_s8, 128  ;;  %s587_s21 = smov [#allocation5]  }
  0x2e   : > { %v213_v7 = vrot.slane %v212_v5, 4  ;;  %v278_v47 = vunpack.c.0.s8 %v277_v44  ;;  %p503_p8 = scmp.ne.s32.totalorder %s304_s8, %s502_s19  ;;  %s506_s15 = sshll.u32 %s587_s21, 4  ;;  %s507_s15 = int_to_ptr.vmem [resolvable:$false] %s506_s15 }
  0x2f   : > { %v219_v6 = vsel %vm211_vm0, %v209_v4, 0.0  ;;  %s508_s23 = scalar_lea.vmem %s507_s15, 256  ;;  %p509_p0 = scmp.lt.s32.totalorder %s304_s8, %s507_s15 }
  0x30   : > { %274 = vperm.xlu0 %468, %v259_v2   ;;  %v220_v8 = vrot.slane %v219_v6, 4  ;;  %v214_v9 = vadd.f32 %v213_v7, %v212_v5  ;;  %v281_v53 = vsub.s32 %v278_v47, %v280_v48  ;;  %p504_p11 = pnand %p503_p8, %p659_p9  ;;  %p510_p1 = scmp.lt.s32.totalorder %s508_s23, %s502_s19 }
  0x32   : > { %v221_v10 = vadd.f32 %v220_v8, %v219_v6  ;;  %v215_v11 = vrot.slane %v214_v9, 2  ;;  %p505_p12 = pneg %p504_p11  ;;  %p511_p2 = por %p510_p1, %p509_p0 }
  0x34   : > { %v222_v12 = vrot.slane %v221_v10, 2  ;;  %v216_v13 = vadd.f32 %v215_v11, %v214_v9  ;;  %p512_p3 = pnand %p511_p2, %p505_p12 }
  0x36   : > { %v223_v14 = vadd.f32 %v222_v12, %v221_v10  ;;  %v217_v15 = vrot.slane %v216_v13, 1 }
  0x38   : > { %v224_v16 = vrot.slane %v223_v14, 1  ;;  %v218_v17 = vadd.f32 %v217_v15, %v216_v13 }
  0x3a   : > { %v225_v18 = vadd.f32 %v224_v16, %v223_v14  ;;  %v227_v19 = vmul.f32 0.25, %v218_v17 }
  0x3c   : > { %v228_v20 = vmul.f32 0.25, %v225_v18 }
  0x3e   : > { %v231_v21 = vcombine.low %v227_v19, %v228_v20 }
  0x40   : > { %v233_v22 = vsub.f32 %v207_v3, %v231_v21 }
  0x42   : > { %v234_v23 = vmul.f32 %v233_v22, %v233_v22 }
  0x44   : > { %v236_v24 = vcombine.high %v234_v23, %v234_v23  ;;  %v238_v25 = vsel %vm211_vm0, %v234_v23, 0.0 }
  0x45   : > { %v239_v27 = vrot.slane %v238_v25, 4 }
  0x46   : > { %v245_v26 = vsel %vm211_vm0, %v236_v24, 0.0 }
  0x47   : > { %v246_v28 = vrot.slane %v245_v26, 4  ;;  %v240_v29 = vadd.f32 %v239_v27, %v238_v25 }
  0x49   : > { %v247_v30 = vadd.f32 %v246_v28, %v245_v26  ;;  %v241_v31 = vrot.slane %v240_v29, 2 }
  0x4b   : > { %v248_v32 = vrot.slane %v247_v30, 2  ;;  %v242_v33 = vadd.f32 %v241_v31, %v240_v29 }
  0x4d   : > { %v249_v34 = vadd.f32 %v248_v32, %v247_v30  ;;  %v243_v35 = vrot.slane %v242_v33, 1 }
  0x4f   : > { %v250_v36 = vrot.slane %v249_v34, 1  ;;  %v244_v37 = vadd.f32 %v243_v35, %v242_v33 }
  0x51   : > { %v251_v38 = vadd.f32 %v250_v36, %v249_v34  ;;  %v252_v39 = vmul.f32 0.25, %v244_v37 }
  0x53   : > { %v253_v40 = vmul.f32 0.25, %v251_v38  ;;  %v254_v41 = vadd.f32 1e-06, %v252_v39 }
  0x55   : > { %v255_v42 = vadd.f32 1e-06, %v253_v40  ;;  %470 = vrsqrt.f32 %v254_v41 }
  0x57   : > { %472 = vrsqrt.f32 %v255_v42 }
  0x62   : > { %v471_v46 = vpop.eup %470 }
  0x64   : > { %v473_v49 = vpop.eup %472 }
  0xa7   : > { %v263_v50 = vpop.permute.xlu0 %262 }
  0xa8   : > { %v265_v51 = vmul.f32 %v471_v46, %v263_v50  ;;  %v266_v52 = vmul.f32 %v473_v49, %v263_v50 }
  0xaa   : > { %v269_v54 = vcombine.low %v265_v51, %v266_v52 }
  0xab   : > { %v275_v55 = vpop.permute.xlu0 %274 }
  0xac   : > { %v271_v56 = vmul.f32 %v269_v54, %v233_v22  ;;  %v282_v57 = vrot.slane %v275_v55, %v281_v53 }
  0xae   : > { %v284_v58 = vadd.f32 %v282_v57, %v271_v56 }
  0xb0   : > { %285 = vst [vmem:[%s204_s7] sm:$0xff] %v284_v58 }
  0xb1   : > { %515 = shalt.err (!%p512_p3)
}
  0xb2   : > { %s516_s28 = scalar_lea.hbm %s301_s11, 128  ;;  %s520_s30 = scalar_lea.hbm %s759_s3, 256 }
  0xb3   : > { %p517_p5 = scmp.ne.s32.totalorder %s301_s11, %s516_s28  ;;  %p521_p10 = scmp.lt.s32.totalorder %s301_s11, %s759_s3 }
  0xb4   : > { %p522_p4 = scmp.lt.s32.totalorder %s520_s30, %s516_s28 }
  0xb5   : > { %p518_p6 = pnand %p517_p5, %p659_p9 }
  0xb6   : > { %p523_p13 = por %p522_p4, %p521_p10 }
  0xb7   : > { %p519_p7 = pneg %p518_p6 }
  0xb9   : > { %p524_p8 = pnand %p523_p13, %p519_p7 }
  0xbb   : > { %527 = shalt.err (!%p524_p8)
}
  0xbc   : > { %406 = dma.vmem_to_hbm [thread:$0]  (%p659_p9), %s304_s8, 128, %s301_s11, %s287_s18  }
  0xbd PF: > { %s315_s6 = sand.u32 1, %s562_s12   ;;  %p765_p11 = scmp.ne.s32.totalorder %s763_s27, 0 }
  0xbe   : > { %p766_p12 = scmp.ge.s32.totalorder %s582_s17, 2  ;;  %s316_s24 = scalar_lea.sflag [#allocation4], %s315_s6 }
  0xc0   : > { %p413_p0 = pnand %p766_p12, %p765_p11 }
  0xc2   : > { %p414_p1 = pneg %p413_p0 }
  0xc4   : > { %557 = dma.done.wait (%p414_p1), %s316_s24, 128  }
  0xc5   : > { %559 = vsyncadd (%p414_p1), %s316_s24, 4294967168  ;;  %s19_s17 = sadd.s32 1, %s582_s17   ;;  %s767_s12 = smov %s566_s13 }
  0xc6   : > { %p16_p2 = scmp.ge.s32.totalorder %s19_s17, 4   ;;  %s768_s13 = smov %s570_s14 }
  0xc7   : > { %s769_s14 = smov %s664_s26  ;;  %s770_s15 = smov %s578_s16 }
  0xc8   : > { %s771_s16 = smov %s773_s20  ;;  %18 = sbr.rel (!%p16_p2) target bundleno = 6 (0x6), region = 77 }
  0xcd   :  { %321 = vsyncpa [#allocation3], 1 }
  0xce   :  { %323 = vsyncpa [#allocation3 + $0x1], 1 }
  0xcf   :  { %324 = vsyncpa [#allocation4], 1 }
  0xd0   :  { %326 = vsyncpa [#allocation4 + $0x1], 1 }

</bundles_post_ra>
